<compile_context>
chip_gen: v7x
topology: tpu7x:2x2x1
jax: 0.10.0
libtpu: 0.0.40
codegen_flags: <defaults>
</compile_context>

<pallas_src>
import functools
import math

import jax
import jax.numpy as jnp
from jax.experimental import pallas as pl
from jax.experimental.pallas import tpu as pltpu

LANES = 128
SUBLANES = 8


def _int_pow(x, gamma):
    """x ** gamma; expands small integer gamma to VPU multiplies."""
    g = float(gamma)
    gi = int(g)
    if g == float(gi) and 0 <= gi <= 32:
        if gi == 0:
            return jnp.ones_like(x)
        result = None
        base = x
        e = gi
        while e > 0:
            if e & 1:
                result = base if result is None else result * base
            e >>= 1
            if e:
                base = base * base
        return result
    return jnp.power(x, g)  # non-integer gamma: fall back to EUP pow


def _focal_terms(x, t, gamma, alpha):
    """Per-element focal loss from raw logits x and targets t (f32 math)."""
    x = x.astype(jnp.float32)
    t = t.astype(jnp.float32)

    # softplus(x) = log(1 + exp(x)), numerically stable.
    sp = jnp.maximum(x, 0.0) + jnp.log1p(jnp.exp(-jnp.abs(x)))
    log_p_raw = x - sp                       # log(sigmoid(x)), never -inf
    # PyTorch's binary_cross_entropy clamps log terms at -100; apply the clamp
    # to the *derived* logs as the final step (do not derive one from the
    # clamped other).
    log_p = jnp.maximum(log_p_raw, -100.0)
    log_1mp = jnp.maximum(-sp, -100.0)       # log(1 - sigmoid(x))

    one_m_t = 1.0 - t
    bce = -(t * log_p + one_m_t * log_1mp)

    p = jnp.exp(log_p_raw)                   # sigmoid(x)
    # 1 - p_t == t*(1-p) + (1-t)*p   (exact algebra; holds for soft labels).
    one_minus_pt = t * (1.0 - p) + one_m_t * p
    focal = _int_pow(one_minus_pt, gamma)

    if alpha != 0.5:
        alpha_t = alpha * t + (1.0 - alpha) * one_m_t
        return alpha_t * focal * bce
    return focal * bce                        # PyTorch branch: alpha_t == 1


def _focal_loss_kernel(pred_ref, tgt_ref, out_ref, *, gamma, alpha,
                       num_blocks, acc_rows, has_overhang):
    c = pl.program_id(0)          # TensorCore split axis   ("parallel")
    i = pl.program_id(1)          # reduction axis          ("arbitrary")
    inner = pl.num_programs(1)

    # Zero this core's resident (1, acc_rows, 128) accumulator at loop start.
    @pl.when(i == 0)
    def _():
        out_ref[...] = jnp.zeros_like(out_ref)

    def accumulate():
        loss = _focal_terms(pred_ref[...], tgt_ref[...], gamma, alpha)
        # Partial sum into acc_rows independent (1,128)-lane chains (pure VALU).
        out_ref[...] += loss.reshape(-1, acc_rows, LANES).sum(axis=0, keepdims=True)

    if has_overhang:
        # Odd block count split over 2 cores: the clamped duplicate block reads
        # valid data but must not be counted twice -- scalar guard, no mask.
        pl.when(c * inner + i < num_blocks)(accumulate)
    else:
        accumulate()


@functools.partial(jax.jit, static_argnames=("gamma", "alpha", "tile_rows"))
def focal_loss(pred, target, gamma=5.0, alpha=0.5, tile_rows=4096):
    """Mean focal loss; `pred` are raw logits (sigmoid applied inside)."""
    assert pred.shape == target.shape
    assert tile_rows % SUBLANES == 0
    n_elem = pred.size

    # Flatten (free for contiguous tensors); keep native dtype, no pad, no cast.
    pred_flat = pred.reshape(-1)
    tgt_flat = target.reshape(-1)

    rows_main = (n_elem // LANES) // SUBLANES * SUBLANES
    if rows_main == 0:
        # Tiny input: not even one (8,128) tile to stream; pure-jnp fallback.
        return _focal_terms(pred_flat, tgt_flat, gamma, alpha).sum() / jnp.float32(n_elem)

    block_rows = min(tile_rows, rows_main)     # multiple of 8, or the full dim
    num_blocks = rows_main // block_rows
    rows_kernel = num_blocks * block_rows      # kernel sees only full blocks
    n_kernel = rows_kernel * LANES

    # Aligned prefix -> lane-dense (rows, 128) slab.  No-op when n_elem is a
    # multiple of the block size (typical NCHW tensors).
    pred2d = pred_flat[:n_kernel].reshape(rows_kernel, LANES)
    tgt2d = tgt_flat[:n_kernel].reshape(rows_kernel, LANES)

    # Megacore split (v7x); only when each core gets >= 4 grid steps.
    num_cores = 2 if num_blocks >= 8 else 1
    inner = pl.cdiv(num_blocks, num_cores)
    has_overhang = (num_cores * inner != num_blocks)

    # Up to (64,128) resident accumulator; acc_rows always divides block_rows.
    acc_rows = math.gcd(block_rows, 64)

    def in_map(c, i):
        # Clamp so the overhang step (odd block count) never DMAs out of
        # bounds; its contribution is skipped by the in-kernel scalar guard.
        return (jnp.minimum(c * inner + i, num_blocks - 1), 0)

    kernel = functools.partial(
        _focal_loss_kernel, gamma=gamma, alpha=alpha,
        num_blocks=num_blocks, acc_rows=acc_rows, has_overhang=has_overhang)

    in_bytes = (pred2d.size * pred2d.dtype.itemsize
                + tgt2d.size * tgt2d.dtype.itemsize)
    out_bytes = num_cores * acc_rows * LANES * 4

    partials = pl.pallas_call(
        kernel,
        out_shape=jax.ShapeDtypeStruct((num_cores, acc_rows, LANES), jnp.float32),
        grid_spec=pltpu.PrefetchScalarGridSpec(
            num_scalar_prefetch=0,
            grid=(num_cores, inner),
            in_specs=[
                pl.BlockSpec((block_rows, LANES), in_map),
                pl.BlockSpec((block_rows, LANES), in_map),
            ],
            out_specs=pl.BlockSpec((1, acc_rows, LANES), lambda c, i: (c, 0, 0)),
        ),
        compiler_params=pltpu.CompilerParams(
            dimension_semantics=("parallel", "arbitrary")),
        cost_estimate=pl.CostEstimate(
            flops=20 * n_kernel,
            transcendentals=3 * n_kernel,
            bytes_accessed=in_bytes + out_bytes),
    )(pred2d, tgt2d)

    total = jnp.sum(partials)

    # Ragged leftover (< one block, only for non-aligned sizes): plain jnp sum.
    if n_kernel < n_elem:
        total = total + _focal_terms(pred_flat[n_kernel:], tgt_flat[n_kernel:],
                                     gamma, alpha).sum()

    return total / jnp.float32(n_elem)


def focal_loss_ref(pred, target, gamma=5.0, alpha=0.5):
    """Pure-JAX mirror of the PyTorch FocalLoss.forward."""
    p = jax.nn.sigmoid(pred.astype(jnp.float32))
    t = target.astype(jnp.float32)
    bce = -(t * jnp.maximum(jnp.log(p), -100.0)
            + (1.0 - t) * jnp.maximum(jnp.log(1.0 - p), -100.0))
    p_t = p * t + (1.0 - p) * (1.0 - t)
    alpha_t = 1.0 if alpha == 0.5 else alpha * t + (1.0 - alpha) * (1.0 - t)
    return jnp.mean(alpha_t * jnp.power(1.0 - p_t, gamma) * bce)


if __name__ == "__main__":
    key = jax.random.PRNGKey(0)
    k1, k2 = jax.random.split(key)
    # NCHW inputs like the PyTorch module would see (e.g. UNet logits / masks).
    x = jax.random.normal(k1, (2, 4, 16, 16), dtype=jnp.float32)   # logits
    y = (jax.random.uniform(k2, (2, 4, 16, 16)) > 0.5).astype(jnp.float32)

    out = focal_loss(x, y, gamma=5.0, alpha=0.5)
    out = jax.block_until_ready(out)

    ref = focal_loss_ref(x, y, gamma=5.0, alpha=0.5)
    assert jnp.allclose(out, ref, rtol=1e-4, atol=1e-6), (out, ref)
    print("KERNEL_OK")
</pallas_src>

<mosaic_0001>
module attributes {stable_mosaic.version = 11 : i64} {
  func.func @_focal_loss_kernel(%arg0: i32, %arg1: i32, %arg2: memref<16x128xf32, #tpu.memory_space<vmem>>, %arg3: memref<16x128xf32, #tpu.memory_space<vmem>>, %arg4: memref<1x16x128xf32, #tpu.memory_space<vmem>>) attributes {dimension_semantics = [#tpu.dimension_semantics<parallel>, #tpu.dimension_semantics<arbitrary>], iteration_bounds = array<i64: 1, 1>, scalar_prefetch = 0 : i64, scratch_operands = 0 : i64, tpu.core_type = #tpu.core_type<tc>, window_params = [{transform_indices = @transform_0, window_bounds = array<i64: 16, 128>}, {transform_indices = @transform_1, window_bounds = array<i64: 16, 128>}, {transform_indices = @transform_2, window_bounds = array<i64: 1, 16, 128>}]} {
    %c0_i32 = arith.constant 0 : i32
    %0 = arith.cmpi eq, %arg1, %c0_i32 : i32
    %1 = arith.extui %0 : i1 to i32
    %c0_i32_0 = arith.constant 0 : i32
    %2 = arith.cmpi ne, %1, %c0_i32_0 : i32
    scf.if %2 {
      %cst_18 = arith.constant 0.000000e+00 : f32
      %43 = vector.broadcast %cst_18 : f32 to vector<1x16x128xf32>
      %c0_19 = arith.constant 0 : index
      %c0_20 = arith.constant 0 : index
      %c0_21 = arith.constant 0 : index
      %44 = vector.load %arg4[%c0_19, %c0_20, %c0_21] : memref<1x16x128xf32, #tpu.memory_space<vmem>>, vector<1x16x128xf32>
      tpu.vector_store %arg4[%c0_19, %c0_20, %c0_21], %43 {strides = array<i32>} : memref<1x16x128xf32, #tpu.memory_space<vmem>>, vector<1x16x128xf32>,
    } else {
    }
    %c0 = arith.constant 0 : index
    %c0_1 = arith.constant 0 : index
    %3 = vector.load %arg2[%c0, %c0_1] : memref<16x128xf32, #tpu.memory_space<vmem>>, vector<16x128xf32>
    %c0_2 = arith.constant 0 : index
    %c0_3 = arith.constant 0 : index
    %4 = vector.load %arg3[%c0_2, %c0_3] : memref<16x128xf32, #tpu.memory_space<vmem>>, vector<16x128xf32>
    %cst = arith.constant 0.000000e+00 : f32
    %5 = vector.broadcast %cst : f32 to vector<16x128xf32>
    %6 = arith.maximumf %3, %5 : vector<16x128xf32>
    %7 = math.absf %3 : vector<16x128xf32>
    %cst_4 = arith.constant 0.000000e+00 : f32
    %8 = vector.broadcast %cst_4 : f32 to vector<16x128xf32>
    %9 = arith.subf %8, %7 : vector<16x128xf32>
    %10 = math.exp %9 : vector<16x128xf32>
    %11 = math.log1p %10 : vector<16x128xf32>
    %12 = arith.addf %6, %11 : vector<16x128xf32>
    %13 = arith.subf %3, %12 : vector<16x128xf32>
    %cst_5 = arith.constant -1.000000e+02 : f32
    %14 = vector.broadcast %cst_5 : f32 to vector<16x128xf32>
    %15 = arith.maximumf %13, %14 : vector<16x128xf32>
    %cst_6 = arith.constant 0.000000e+00 : f32
    %16 = vector.broadcast %cst_6 : f32 to vector<16x128xf32>
    %17 = arith.subf %16, %12 : vector<16x128xf32>
    %cst_7 = arith.constant -1.000000e+02 : f32
    %18 = vector.broadcast %cst_7 : f32 to vector<16x128xf32>
    %19 = arith.maximumf %17, %18 : vector<16x128xf32>
    %cst_8 = arith.constant 1.000000e+00 : f32
    %20 = vector.broadcast %cst_8 : f32 to vector<16x128xf32>
    %21 = arith.subf %20, %4 : vector<16x128xf32>
    %22 = arith.mulf %4, %15 : vector<16x128xf32>
    %23 = arith.mulf %21, %19 : vector<16x128xf32>
    %24 = arith.addf %22, %23 : vector<16x128xf32>
    %cst_9 = arith.constant 0.000000e+00 : f32
    %25 = vector.broadcast %cst_9 : f32 to vector<16x128xf32>
    %26 = arith.subf %25, %24 : vector<16x128xf32>
    %27 = math.exp %13 : vector<16x128xf32>
    %cst_10 = arith.constant 1.000000e+00 : f32
    %28 = vector.broadcast %cst_10 : f32 to vector<16x128xf32>
    %29 = arith.subf %28, %27 : vector<16x128xf32>
    %30 = arith.mulf %4, %29 : vector<16x128xf32>
    %31 = arith.mulf %21, %27 : vector<16x128xf32>
    %32 = arith.addf %30, %31 : vector<16x128xf32>
    %33 = arith.mulf %32, %32 : vector<16x128xf32>
    %34 = arith.mulf %33, %33 : vector<16x128xf32>
    %35 = arith.mulf %32, %34 : vector<16x128xf32>
    %36 = arith.mulf %35, %26 : vector<16x128xf32>
    %c0_11 = arith.constant 0 : index
    %c0_12 = arith.constant 0 : index
    %c0_13 = arith.constant 0 : index
    %37 = vector.load %arg4[%c0_11, %c0_12, %c0_13] : memref<1x16x128xf32, #tpu.memory_space<vmem>>, vector<1x16x128xf32>
    %38 = vector.shape_cast %36 : vector<16x128xf32> to vector<1x16x128xf32>
    %cst_14 = arith.constant dense<0.000000e+00> : vector<16x128xf32>
    %39 = vector.multi_reduction <add>, %38, %cst_14 [0] : vector<1x16x128xf32> to vector<16x128xf32>
    %40 = vector.shape_cast %39 : vector<16x128xf32> to vector<1x16x128xf32>
    %41 = arith.addf %37, %40 : vector<1x16x128xf32>
    %c0_15 = arith.constant 0 : index
    %c0_16 = arith.constant 0 : index
    %c0_17 = arith.constant 0 : index
    %42 = vector.load %arg4[%c0_15, %c0_16, %c0_17] : memref<1x16x128xf32, #tpu.memory_space<vmem>>, vector<1x16x128xf32>
    tpu.vector_store %arg4[%c0_15, %c0_16, %c0_17], %41 {strides = array<i32>} : memref<1x16x128xf32, #tpu.memory_space<vmem>>, vector<1x16x128xf32>,
    return
  }
  func.func @transform_0(%arg0: i32, %arg1: i32) -> (i32, i32) {
    %c1_i32 = arith.constant 1 : i32
    %0 = arith.muli %arg0, %c1_i32 : i32
    %1 = arith.addi %0, %arg1 : i32
    %c0_i32 = arith.constant 0 : i32
    %2 = arith.minsi %1, %c0_i32 : i32
    %c0_i32_0 = arith.constant 0 : i32
    %c0_i32_1 = arith.constant 0 : i32
    return %2, %c0_i32_0 : i32, i32
  }
  func.func @transform_1(%arg0: i32, %arg1: i32) -> (i32, i32) {
    %c1_i32 = arith.constant 1 : i32
    %0 = arith.muli %arg0, %c1_i32 : i32
    %1 = arith.addi %0, %arg1 : i32
    %c0_i32 = arith.constant 0 : i32
    %2 = arith.minsi %1, %c0_i32 : i32
    %c0_i32_0 = arith.constant 0 : i32
    %c0_i32_1 = arith.constant 0 : i32
    return %2, %c0_i32_0 : i32, i32
  }
  func.func @transform_2(%arg0: i32, %arg1: i32) -> (i32, i32, i32) {
    %c0_i32 = arith.constant 0 : i32
    %c0_i32_0 = arith.constant 0 : i32
    %c0_i32_1 = arith.constant 0 : i32
    return %arg0, %c0_i32, %c0_i32_0 : i32, i32, i32
  }
}

</mosaic_0001>

<bundles_post_ra>
// kernel: focal_loss.1
= control target key start
LH: loop header
LB: loop body
LE: loop exit
PB: predicated region body
PF: predicated region fallthrough
CT: control target
= control target key end

     0   :  { %s223_s0 = inlined_call_operand.vmem [shape: f32[16,128], index: 0, kind: input, shape index: {}]   ;;  %s224_s1 = inlined_call_operand.vmem [shape: f32[16,128], index: 1, kind: input, shape index: {}]   ;;  %s225_s2 = inlined_call_operand.vmem [shape: f32[1,16,128], index: 2, kind: output, shape index: {}]  }
   0x1   :  { %v81_v0 = vld [vmem:[%s223_s0] sm:$0xff]  ;;  %v82_v1 = vld [vmem:[%s223_s0 + $0x8] sm:$0xff] }
   0x2   :  { %v87_v2 = vand.u32 2147483647, %v81_v0  ;;  %v88_v3 = vand.u32 2147483647, %v82_v1  ;;  %v85_v20 = vmax.f32 %v81_v0, 0.0  ;;  %v86_v24 = vmax.f32 %v82_v1, 0.0 }
   0x3   :  { %v83_v35 = vld [vmem:[%s224_s1] sm:$0xff]  ;;  %v84_v37 = vld [vmem:[%s224_s1 + $0x8] sm:$0xff] }
   0x4   :  { %v89_v4 = vsub.f32 0.0, %v87_v2  ;;  %v90_v5 = vsub.f32 0.0, %v88_v3  ;;  %v123_v40 = vsub.f32 1.0, %v83_v35  ;;  %v124_v43 = vsub.f32 1.0, %v84_v37 }
   0x6   :  { %v91_v6 = vmul.f32 1.442695, %v89_v4  ;;  %v93_v7 = vmul.f32 1.442695, %v90_v5 }
   0x8   :  { %178 = vpow2.f32 %v91_v6 }
   0x9   :  { %180 = vpow2.f32 %v93_v7 }
  0x12   :  { %v179_v8 = vpop.eup %178 }
  0x13   :  { %v181_v9 = vpop.eup %180  ;;  %v95_v10 = vadd.f32 1.0, %v179_v8  ;;  %v98_v12 = vmul.f32 -0.5, %v179_v8  ;;  %v101_v15 = vand.u32 2147483647, %v179_v8 }
  0x14   :  { %v104_v11 = vadd.f32 1.0, %v181_v9  ;;  %v107_v13 = vmul.f32 -0.5, %v181_v9  ;;  %v110_v17 = vand.u32 2147483647, %v181_v9 }
  0x15   :  { %182 = vlog2.f32 %v95_v10  ;;  %v99_v14 = vadd.f32 1.0, %v98_v12  ;;  %vm102_vm0 = vcmp.lt.f32.partialorder %v101_v15, 0.0004427343 }
  0x16   :  { %184 = vlog2.f32 %v104_v11  ;;  %v108_v16 = vadd.f32 1.0, %v107_v13  ;;  %vm111_vm1 = vcmp.lt.f32.partialorder %v110_v17, 0.0004427343 }
  0x17   :  { %v100_v18 = vmul.f32 %v179_v8, %v99_v14 }
  0x18   :  { %v109_v21 = vmul.f32 %v181_v9, %v108_v16 }
  0x1f   :  { %v183_v19 = vpop.eup %182 }
  0x20   :  { %v185_v22 = vpop.eup %184  ;;  %v97_v23 = vmul.f32 0.6931472, %v183_v19 }
  0x21   :  { %v106_v25 = vmul.f32 0.6931472, %v185_v22 }
  0x22   :  { %v103_v26 = vsel %vm102_vm0, %v100_v18, %v97_v23 }
  0x23   :  { %v113_v27 = vadd.f32 %v103_v26, %v85_v20  ;;  %v112_v28 = vsel %vm111_vm1, %v109_v21, %v106_v25 }
  0x24   :  { %v114_v29 = vadd.f32 %v112_v28, %v86_v24 }
  0x25   :  { %v115_v30 = vsub.f32 %v81_v0, %v113_v27  ;;  %v119_v34 = vsub.f32 0.0, %v113_v27 }
  0x26   :  { %v116_v31 = vsub.f32 %v82_v1, %v114_v29  ;;  %v120_v36 = vsub.f32 0.0, %v114_v29 }
  0x27   :  { %v133_v32 = vmul.f32 1.442695, %v115_v30  ;;  %v117_v38 = vmax.f32 %v115_v30, -100.0  ;;  %v121_v39 = vmax.f32 %v119_v34, -100.0 }
  0x28   :  { %v135_v33 = vmul.f32 1.442695, %v116_v31  ;;  %v118_v41 = vmax.f32 %v116_v31, -100.0  ;;  %v122_v42 = vmax.f32 %v120_v36, -100.0 }
  0x29   :  { %186 = vpow2.f32 %v133_v32  ;;  %v125_v46 = vmul.f32 %v117_v38, %v83_v35  ;;  %v127_v47 = vmul.f32 %v123_v40, %v121_v39 }
  0x2a   :  { %188 = vpow2.f32 %v135_v33  ;;  %v126_v50 = vmul.f32 %v118_v41, %v84_v37  ;;  %v128_v51 = vmul.f32 %v124_v43, %v122_v42 }
  0x2b   :  { %v129_v56 = vadd.f32 %v127_v47, %v125_v46 }
  0x2c   :  { %v130_v58 = vadd.f32 %v128_v51, %v126_v50 }
  0x2d   :  { %v131_v62 = vsub.f32 0.0, %v129_v56 }
  0x2e   :  { %v132_v0 = vsub.f32 0.0, %v130_v58 }
  0x33   :  { %v187_v44 = vpop.eup %186 }
  0x34   :  { %v189_v45 = vpop.eup %188  ;;  %v137_v48 = vsub.f32 1.0, %v187_v44  ;;  %v141_v49 = vmul.f32 %v187_v44, %v123_v40 }
  0x35   :  { %v138_v52 = vsub.f32 1.0, %v189_v45  ;;  %v142_v53 = vmul.f32 %v189_v45, %v124_v43 }
  0x36   :  { %v139_v54 = vmul.f32 %v137_v48, %v83_v35 }
  0x37   :  { %v140_v55 = vmul.f32 %v138_v52, %v84_v37 }
  0x38   :  { %v143_v57 = vadd.f32 %v141_v49, %v139_v54 }
  0x39   :  { %v144_v59 = vadd.f32 %v142_v53, %v140_v55 }
  0x3a   :  { %v145_v60 = vmul.f32 %v143_v57, %v143_v57 }
  0x3b   :  { %v146_v61 = vmul.f32 %v144_v59, %v144_v59 }
  0x3c   :  { %v147_v63 = vmul.f32 %v145_v60, %v145_v60 }
  0x3d   :  { %v148_v1 = vmul.f32 %v146_v61, %v146_v61 }
  0x3e   :  { %v149_v2 = vmul.f32 %v147_v63, %v143_v57 }
  0x3f   :  { %v150_v3 = vmul.f32 %v148_v1, %v144_v59 }
  0x40   :  { %v151_v4 = vmul.f32 %v149_v2, %v131_v62 }
  0x41   :  { %v152_v5 = vmul.f32 %v150_v3, %v132_v0 }
  0x42   :  { %159 = vst [vmem:[%s225_s2] sm:$0xff] %v151_v4 }
  0x43   :  { %160 = vst [vmem:[%s225_s2 + $0x8] sm:$0xff] %v152_v5 }

</bundles_post_ra>
